<compile_context>
chip_gen: v7x
topology: tpu7x:2x2x1
jax: 0.10.0
libtpu: 0.0.40
codegen_flags: <defaults>
</compile_context>

<pallas_src>
import functools

import numpy as np
import jax
import jax.numpy as jnp
from jax import lax
from jax.experimental import pallas as pl
from jax.experimental.pallas import tpu as pltpu


def _mos_kernel(pi_ref, q_ref, k_ref, v_ref, out_ref, attn_ref, *,
                inv_temp, n_mix, exp_dtype):
    # pi_ref:   SMEM (B*m,) f32 mixture gates
    # q_ref:    (1, m, d, TILE_N)     k_ref: (1, m, d, N2)     v_ref: (1, N2, d_v)
    # out_ref:  (1, TILE_N, d_v)      attn_ref: (1, TILE_N, N2)
    b = pl.program_id(0)

    def mixture_term(j):
        # Fold 1/temperature into the small (d, TILE_N) q tile (not the scores).
        qj = q_ref[0, j] * inv_temp                                # (d, TILE_N)
        kj = k_ref[0, j]                                           # (d, N2)
        # s[n, k] = sum_d qj[d, n] * kj[d, k]   (transposed-LHS matmul, f32 acc)
        s = lax.dot_general(
            qj, kj,
            dimension_numbers=(((0,), (0,)), ((), ())),
            preferred_element_type=jnp.float32)                    # (TILE_N, N2) f32
        s = s - jnp.max(s, axis=-1, keepdims=True)
        p = jnp.exp(s.astype(exp_dtype))                           # bf16 EUP on v6e/v7x
        l = jnp.sum(p, axis=-1, keepdims=True, dtype=jnp.float32)  # (TILE_N, 1) f32
        # Fused softmax-normalize + mixture weighting; exact divide (rows sum to 1).
        scale = pi_ref[b * n_mix + j] / l
        return p * scale                                           # promotes to f32
        # dropout: identity (eval mode)

    # Initialize the accumulator from the first mixture term (saves one zero-fill
    # plus one add pass over a (TILE_N, N2) f32 temporary per grid step).
    acc = mixture_term(0)
    for j in range(1, n_mix):        # n_mix is tiny (typically 2) -> static unroll
        acc = acc + mixture_term(j)

    attn_ref[0] = acc.astype(attn_ref.dtype)

    # out[n, dv] = sum_k attn[n, k] * v[k, dv] -- plain matmul against the
    # pre-transposed, VMEM-resident v block.  Always uses the f32 accumulator
    # (cast to the input dtype), regardless of a narrower attn output dtype.
    out = jnp.dot(acc.astype(v_ref.dtype), v_ref[0],
                  preferred_element_type=jnp.float32)              # (TILE_N, d_v)
    out_ref[0] = out.astype(out_ref.dtype)


def _vmem_capacity_bytes():
    try:
        return int(pltpu.get_tpu_info().vmem_capacity_bytes)
    except Exception:
        return 64 * 1024 * 1024          # conservative fallback (v7x per-TensorCore)


def _has_bf16_eup():
    # bf16 exp/EUP path exists on v6e / v7x; v5e and older have no bf16 EUP/VPU.
    try:
        kind = jax.devices()[0].device_kind.lower()
    except Exception:
        return False
    return any(tag in kind for tag in ("v6", "v7", "tpu7"))


def _plan_tiling(N, N2, d_k, d_v, in_itemsize, attn_itemsize):
    """Pick TILE_N and a vmem_limit derived from the actual block shapes."""
    cap = _vmem_capacity_bytes()
    budget = int(cap * 0.7)

    def vmem_need(tile):
        q_b = 2 * d_k * tile * in_itemsize            # double-buffered q tiles
        k_b = 2 * d_k * N2 * in_itemsize              # resident k (2 bufs)
        v_b = 2 * N2 * d_v * in_itemsize              # resident v (2 bufs)
        o_b = 2 * tile * d_v * in_itemsize            # out tiles
        a_b = 2 * tile * N2 * attn_itemsize           # attn tiles (dominant write)
        tmp_b = 3 * tile * N2 * 4                     # s / p / acc f32 temporaries
        return q_b + k_b + v_b + o_b + a_b + tmp_b

    tile_n = None
    for t in (512, 256, 128):                         # big tiles cut per-step overhead
        if N % t == 0 and vmem_need(t) <= budget:
            tile_n = t
            break
    if tile_n is None:
        # Small N: one full-N block.  Large ragged N: cdiv grid with a masked tail
        # tile (keeps VMEM bounded instead of one huge full-N block).
        tile_n = N if N <= 128 else 128

    limit = int(vmem_need(tile_n) * 1.5) + (4 << 20)  # headroom for Mosaic scratch
    limit = max(32 << 20, min(limit, min(cap, 128 << 20)))
    return tile_n, limit


def mixture_of_softmax(qt, kt, vt, weight, n_mix, *, attn_dtype=None):
    """qt: (B, d_k, N), kt: (B, d_k, N2), vt: (B, d_v, N2), weight: (n_mix, d_k) or None.

    Returns (out (B, N, d_v) in qt.dtype, attn (B, N, N2) in attn_dtype or qt.dtype).
    """
    B, d_k, N = qt.shape
    m = n_mix
    d = d_k // m
    N2 = kt.shape[2]
    d_v = vt.shape[1]
    attn_dtype = jnp.dtype(qt.dtype if attn_dtype is None else attn_dtype)

    # Natural (free) reshapes for q / k; one cheap transpose of the small v tensor so
    # the second matmul contracts v's leading dim (no per-step transpose of the
    # resident v block).
    q = qt.reshape(B, m, d, N)                        # (B, m, d, N)
    k = kt.reshape(B, m, d, N2)                       # (B, m, d, N2)
    v = jnp.transpose(vt, (0, 2, 1))                  # (B, N2, d_v)

    # Mixture gate pi needs the mean over the FULL N -> compute once per batch here
    # (tiny matmul) and hand it to every grid step as a flat f32 SMEM vector.
    if m > 1:
        bar_qt = jnp.mean(qt.astype(jnp.float32), axis=2)           # (B, d_k)
        logits = bar_qt @ weight.astype(jnp.float32).T              # (B, m)
        pi = jax.nn.softmax(logits, axis=1).reshape(B * m)          # (B*m,) f32
    else:
        pi = jnp.ones((B,), jnp.float32)

    inv_temp = 1.0 / float(np.sqrt(d_k))
    exp_dtype = jnp.bfloat16 if _has_bf16_eup() else jnp.float32

    tile_n, vmem_limit = _plan_tiling(
        N, N2, d_k, d_v, jnp.dtype(qt.dtype).itemsize, attn_dtype.itemsize)
    grid = (B, pl.cdiv(N, tile_n))    # inner axis over query tiles -> k/v stay resident

    kernel = functools.partial(_mos_kernel, inv_temp=inv_temp, n_mix=m,
                               exp_dtype=exp_dtype)
    out, attn = pl.pallas_call(
        kernel,
        out_shape=(jax.ShapeDtypeStruct((B, N, d_v), qt.dtype),
                   jax.ShapeDtypeStruct((B, N, N2), attn_dtype)),
        grid=grid,
        in_specs=[
            pl.BlockSpec(memory_space=pltpu.MemorySpace.SMEM),            # pi (whole, SMEM)
            pl.BlockSpec((1, m, d, tile_n), lambda b, n: (b, 0, 0, n)),   # q tile
            pl.BlockSpec((1, m, d, N2),     lambda b, n: (b, 0, 0, 0)),   # k (resident over n)
            pl.BlockSpec((1, N2, d_v),      lambda b, n: (b, 0, 0)),      # v (resident over n)
        ],
        out_specs=(
            pl.BlockSpec((1, tile_n, d_v), lambda b, n: (b, n, 0)),
            pl.BlockSpec((1, tile_n, N2),  lambda b, n: (b, n, 0)),
        ),
        compiler_params=pltpu.CompilerParams(
            dimension_semantics=("parallel", "parallel"),
            vmem_limit_bytes=vmem_limit,       # derived from block shapes + device VMEM
        ),
    )(pi, q, k, v)
    return out, attn


def reference(qt, kt, vt, weight, n_mix):
    """Pure-JAX transcription of the torch forward (dropout = identity)."""
    B, d_k, N = qt.shape
    m = n_mix
    d = d_k // m
    N2 = kt.shape[2]
    temperature = np.sqrt(d_k)
    bar_qt = jnp.mean(qt, axis=2, keepdims=True)                 # (B, d_k, 1)
    logits = jnp.einsum('md,bdo->bmo', weight, bar_qt)           # (B, m, 1)
    pi = jax.nn.softmax(logits, axis=1).reshape(B * m, 1, 1)
    q = jnp.transpose(qt.reshape(B * m, d, N), (0, 2, 1))        # (B*m, N, d)
    k = kt.reshape(B * m, d, N2)
    v = jnp.transpose(vt, (0, 2, 1))
    attn = jnp.matmul(q, k) / temperature
    attn = jax.nn.softmax(attn, axis=2)
    attn = (attn * pi).reshape(B, m, N, N2).sum(1)
    out = jnp.matmul(attn, v)
    return out, attn


if __name__ == "__main__":
    configs = [
        # (B, n_mix, d_k, N,   N2,  d_v, attn_dtype)
        (2, 2, 32, 16, 16, 32, None),              # tiny: single full-N block per batch
        (2, 2, 64, 384, 256, 64, jnp.bfloat16),    # multi-tile query axis + bf16 attn out
    ]
    for (B, n_mix, d_k, N, N2, d_v, attn_dtype) in configs:
        key = jax.random.PRNGKey(0)
        k1, k2, k3, k4 = jax.random.split(key, 4)
        qt = jax.random.normal(k1, (B, d_k, N), jnp.float32)
        kt = jax.random.normal(k2, (B, d_k, N2), jnp.float32)
        vt = jax.random.normal(k3, (B, d_v, N2), jnp.float32)

        # deterministic parameter init mirroring __init__: uniform(-m^-0.5, m^-0.5)
        std = float(np.power(n_mix, -0.5))
        weight = jax.random.uniform(k4, (n_mix, d_k), jnp.float32, -std, std)

        out, attn = mixture_of_softmax(qt, kt, vt, weight, n_mix,
                                       attn_dtype=attn_dtype)
        jax.block_until_ready((out, attn))

        ref_out, ref_attn = reference(qt, kt, vt, weight, n_mix)
        out_np = np.asarray(jnp.asarray(out, jnp.float32))
        attn_np = np.asarray(jnp.asarray(attn, jnp.float32))
        # bf16 exp (only on v6e/v7x) and/or a bf16 attn output add ~1e-3-level
        # deviations vs. the f32 reference; f32 path is much tighter.
        a_atol, a_rtol = (5e-3, 1e-2) if attn_dtype == jnp.bfloat16 else (3e-3, 3e-3)
        assert np.allclose(attn_np, np.asarray(ref_attn), atol=a_atol, rtol=a_rtol), \
            float(np.abs(attn_np - np.asarray(ref_attn)).max())
        assert np.allclose(out_np, np.asarray(ref_out), atol=3e-3, rtol=3e-3), \
            float(np.abs(out_np - np.asarray(ref_out)).max())

    print("KERNEL_OK")
</pallas_src>

<mosaic_0001>
module attributes {stable_mosaic.version = 11 : i64} {
  func.func @_mos_kernel(%arg0: i32, %arg1: i32, %arg2: memref<4xf32, #tpu.memory_space<smem>>, %arg3: memref<1x2x16x16xf32, #tpu.memory_space<vmem>>, %arg4: memref<1x2x16x16xf32, #tpu.memory_space<vmem>>, %arg5: memref<1x16x32xf32, #tpu.memory_space<vmem>>, %arg6: memref<1x16x32xf32, #tpu.memory_space<vmem>>, %arg7: memref<1x16x16xf32, #tpu.memory_space<vmem>>) attributes {dimension_semantics = [#tpu.dimension_semantics<parallel>, #tpu.dimension_semantics<parallel>], iteration_bounds = array<i64: 2, 1>, scalar_prefetch = 0 : i64, scratch_operands = 0 : i64, tpu.core_type = #tpu.core_type<tc>, window_params = [{transform_indices = @transform_0, window_bounds = array<i64: 4>}, {transform_indices = @transform_1, window_bounds = array<i64: 1, 2, 16, 16>}, {transform_indices = @transform_2, window_bounds = array<i64: 1, 2, 16, 16>}, {transform_indices = @transform_3, window_bounds = array<i64: 1, 16, 32>}, {transform_indices = @transform_4, window_bounds = array<i64: 1, 16, 32>}, {transform_indices = @transform_5, window_bounds = array<i64: 1, 16, 16>}]} {
    %c0 = arith.constant 0 : index
    %c0_0 = arith.constant 0 : index
    %c0_1 = arith.constant 0 : index
    %c0_2 = arith.constant 0 : index
    %0 = vector.load %arg3[%c0, %c0_0, %c0_1, %c0_2] : memref<1x2x16x16xf32, #tpu.memory_space<vmem>>, vector<1x1x16x16xf32>
    %1 = vector.shape_cast %0 : vector<1x1x16x16xf32> to vector<16x16xf32>
    %cst = arith.constant 0.176776692 : f32
    %2 = vector.broadcast %cst : f32 to vector<16x16xf32>
    %3 = arith.mulf %1, %2 : vector<16x16xf32>
    %c0_3 = arith.constant 0 : index
    %c0_4 = arith.constant 0 : index
    %c0_5 = arith.constant 0 : index
    %c0_6 = arith.constant 0 : index
    %4 = vector.load %arg4[%c0_3, %c0_4, %c0_5, %c0_6] : memref<1x2x16x16xf32, #tpu.memory_space<vmem>>, vector<1x1x16x16xf32>
    %5 = vector.shape_cast %4 : vector<1x1x16x16xf32> to vector<16x16xf32>
    %cst_7 = arith.constant dense<0.000000e+00> : vector<16x16xf32>
    %6 = tpu.matmul %3, %5, %cst_7 {dimension_numbers = #tpu.dot_dimension_numbers<[0], [0], [1], [1], [0, 1, 1, 1], [], []>} : vector<16x16xf32>, vector<16x16xf32>, vector<16x16xf32> -> vector<16x16xf32>
    %cst_8 = arith.constant dense<0xFF800000> : vector<16xf32>
    %7 = vector.multi_reduction <maximumf>, %6, %cst_8 [1] : vector<16x16xf32> to vector<16xf32>
    %8 = vector.shape_cast %7 : vector<16xf32> to vector<16x1xf32>
    %9 = vector.broadcast %8 : vector<16x1xf32> to vector<16x16xf32>
    %10 = arith.subf %6, %9 : vector<16x16xf32>
    %11 = math.exp %10 : vector<16x16xf32>
    %cst_9 = arith.constant dense<0.000000e+00> : vector<16xf32>
    %12 = vector.multi_reduction <add>, %11, %cst_9 [1] : vector<16x16xf32> to vector<16xf32>
    %13 = vector.shape_cast %12 : vector<16xf32> to vector<16x1xf32>
    %c2_i32 = arith.constant 2 : i32
    %14 = arith.muli %arg0, %c2_i32 : i32
    %c0_i32 = arith.constant 0 : i32
    %15 = arith.addi %14, %c0_i32 : i32
    %16 = arith.index_cast %15 : i32 to index
    %17 = memref.load %arg2[%16] : memref<4xf32, #tpu.memory_space<smem>>
    %18 = vector.broadcast %17 : f32 to vector<16x1xf32>
    %19 = arith.divf %18, %13 : vector<16x1xf32>
    %20 = vector.broadcast %19 : vector<16x1xf32> to vector<16x16xf32>
    %21 = arith.mulf %11, %20 : vector<16x16xf32>
    %c0_10 = arith.constant 0 : index
    %c1 = arith.constant 1 : index
    %c0_11 = arith.constant 0 : index
    %c0_12 = arith.constant 0 : index
    %22 = vector.load %arg3[%c0_10, %c1, %c0_11, %c0_12] : memref<1x2x16x16xf32, #tpu.memory_space<vmem>>, vector<1x1x16x16xf32>
    %23 = vector.shape_cast %22 : vector<1x1x16x16xf32> to vector<16x16xf32>
    %cst_13 = arith.constant 0.176776692 : f32
    %24 = vector.broadcast %cst_13 : f32 to vector<16x16xf32>
    %25 = arith.mulf %23, %24 : vector<16x16xf32>
    %c0_14 = arith.constant 0 : index
    %c1_15 = arith.constant 1 : index
    %c0_16 = arith.constant 0 : index
    %c0_17 = arith.constant 0 : index
    %26 = vector.load %arg4[%c0_14, %c1_15, %c0_16, %c0_17] : memref<1x2x16x16xf32, #tpu.memory_space<vmem>>, vector<1x1x16x16xf32>
    %27 = vector.shape_cast %26 : vector<1x1x16x16xf32> to vector<16x16xf32>
    %cst_18 = arith.constant dense<0.000000e+00> : vector<16x16xf32>
    %28 = tpu.matmul %25, %27, %cst_18 {dimension_numbers = #tpu.dot_dimension_numbers<[0], [0], [1], [1], [0, 1, 1, 1], [], []>} : vector<16x16xf32>, vector<16x16xf32>, vector<16x16xf32> -> vector<16x16xf32>
    %cst_19 = arith.constant dense<0xFF800000> : vector<16xf32>
    %29 = vector.multi_reduction <maximumf>, %28, %cst_19 [1] : vector<16x16xf32> to vector<16xf32>
    %30 = vector.shape_cast %29 : vector<16xf32> to vector<16x1xf32>
    %31 = vector.broadcast %30 : vector<16x1xf32> to vector<16x16xf32>
    %32 = arith.subf %28, %31 : vector<16x16xf32>
    %33 = math.exp %32 : vector<16x16xf32>
    %cst_20 = arith.constant dense<0.000000e+00> : vector<16xf32>
    %34 = vector.multi_reduction <add>, %33, %cst_20 [1] : vector<16x16xf32> to vector<16xf32>
    %35 = vector.shape_cast %34 : vector<16xf32> to vector<16x1xf32>
    %c2_i32_21 = arith.constant 2 : i32
    %36 = arith.muli %arg0, %c2_i32_21 : i32
    %c1_i32 = arith.constant 1 : i32
    %37 = arith.addi %36, %c1_i32 : i32
    %38 = arith.index_cast %37 : i32 to index
    %39 = memref.load %arg2[%38] : memref<4xf32, #tpu.memory_space<smem>>
    %40 = vector.broadcast %39 : f32 to vector<16x1xf32>
    %41 = arith.divf %40, %35 : vector<16x1xf32>
    %42 = vector.broadcast %41 : vector<16x1xf32> to vector<16x16xf32>
    %43 = arith.mulf %33, %42 : vector<16x16xf32>
    %44 = arith.addf %21, %43 : vector<16x16xf32>
    %c0_22 = arith.constant 0 : index
    %c0_23 = arith.constant 0 : index
    %c0_24 = arith.constant 0 : index
    %45 = vector.load %arg7[%c0_22, %c0_23, %c0_24] : memref<1x16x16xf32, #tpu.memory_space<vmem>>, vector<1x16x16xf32>
    %46 = vector.shape_cast %45 : vector<1x16x16xf32> to vector<16x16xf32>
    %47 = vector.shape_cast %44 : vector<16x16xf32> to vector<1x16x16xf32>
    tpu.vector_store %arg7[%c0_22, %c0_23, %c0_24], %47 {strides = array<i32>} : memref<1x16x16xf32, #tpu.memory_space<vmem>>, vector<1x16x16xf32>,
    %c0_25 = arith.constant 0 : index
    %c0_26 = arith.constant 0 : index
    %c0_27 = arith.constant 0 : index
    %48 = vector.load %arg5[%c0_25, %c0_26, %c0_27] : memref<1x16x32xf32, #tpu.memory_space<vmem>>, vector<1x16x32xf32>
    %49 = vector.shape_cast %48 : vector<1x16x32xf32> to vector<16x32xf32>
    %cst_28 = arith.constant dense<0.000000e+00> : vector<16x32xf32>
    %50 = tpu.matmul %44, %49, %cst_28 {dimension_numbers = #tpu.dot_dimension_numbers<[1], [0], [0], [1], [0, 0, 1, 1], [], []>} : vector<16x16xf32>, vector<16x32xf32>, vector<16x32xf32> -> vector<16x32xf32>
    %c0_29 = arith.constant 0 : index
    %c0_30 = arith.constant 0 : index
    %c0_31 = arith.constant 0 : index
    %51 = vector.load %arg6[%c0_29, %c0_30, %c0_31] : memref<1x16x32xf32, #tpu.memory_space<vmem>>, vector<1x16x32xf32>
    %52 = vector.shape_cast %51 : vector<1x16x32xf32> to vector<16x32xf32>
    %53 = vector.shape_cast %50 : vector<16x32xf32> to vector<1x16x32xf32>
    tpu.vector_store %arg6[%c0_29, %c0_30, %c0_31], %53 {strides = array<i32>} : memref<1x16x32xf32, #tpu.memory_space<vmem>>, vector<1x16x32xf32>,
    return
  }
  func.func @transform_0(%arg0: i32, %arg1: i32) -> i32 {
    %c0_i32 = arith.constant 0 : i32
    %c0_i32_0 = arith.constant 0 : i32
    return %c0_i32 : i32
  }
  func.func @transform_1(%arg0: i32, %arg1: i32) -> (i32, i32, i32, i32) {
    %c0_i32 = arith.constant 0 : i32
    %c0_i32_0 = arith.constant 0 : i32
    %c0_i32_1 = arith.constant 0 : i32
    return %arg0, %c0_i32, %c0_i32_0, %arg1 : i32, i32, i32, i32
  }
  func.func @transform_2(%arg0: i32, %arg1: i32) -> (i32, i32, i32, i32) {
    %c0_i32 = arith.constant 0 : i32
    %c0_i32_0 = arith.constant 0 : i32
    %c0_i32_1 = arith.constant 0 : i32
    %c0_i32_2 = arith.constant 0 : i32
    return %arg0, %c0_i32, %c0_i32_0, %c0_i32_1 : i32, i32, i32, i32
  }
  func.func @transform_3(%arg0: i32, %arg1: i32) -> (i32, i32, i32) {
    %c0_i32 = arith.constant 0 : i32
    %c0_i32_0 = arith.constant 0 : i32
    %c0_i32_1 = arith.constant 0 : i32
    return %arg0, %c0_i32, %c0_i32_0 : i32, i32, i32
  }
  func.func @transform_4(%arg0: i32, %arg1: i32) -> (i32, i32, i32) {
    %c0_i32 = arith.constant 0 : i32
    %c0_i32_0 = arith.constant 0 : i32
    return %arg0, %arg1, %c0_i32 : i32, i32, i32
  }
  func.func @transform_5(%arg0: i32, %arg1: i32) -> (i32, i32, i32) {
    %c0_i32 = arith.constant 0 : i32
    %c0_i32_0 = arith.constant 0 : i32
    return %arg0, %arg1, %c0_i32 : i32, i32, i32
  }
}

</mosaic_0001>

<bundles_post_ra>
// kernel: tpu_custom_call.1
= control target key start
LH: loop header
LB: loop body
LE: loop exit
PB: predicated region body
PF: predicated region fallthrough
CT: control target
= control target key end

     0   :  { %s1803_s0 = inlined_call_operand.hbm [shape: f32[4], index: 0, kind: input, shape index: {}]   ;;  %s1804_s1 = inlined_call_operand.hbm [shape: f32[2,2,16,16], index: 1, kind: input, shape index: {}]   ;;  %s1805_s2 = inlined_call_operand.hbm [shape: f32[2,2,16,16], index: 2, kind: input, shape index: {}]   ;;  %s1806_s3 = inlined_call_operand.hbm [shape: f32[2,16,32], index: 3, kind: input, shape index: {}]   ;;  %s1807_s4 = inlined_call_operand.hbm [shape: f32[2,16,32], index: 4, kind: output, shape index: {0}]   ;;  %s1808_s5 = inlined_call_operand.hbm [shape: f32[2,16,16], index: 5, kind: output, shape index: {1}]  }
   0x1   :  { %1823 = sst [smem:[#allocation22_spill]] %s1804_s1 }
   0x2   :  { %1824 = sst [smem:[#allocation23_spill]] %s1805_s2 }
   0x3   :  { %11 = vsyncpa [#allocation5], 0 }
   0x4   :  { %12 = vsyncpa [#allocation3], 0 }
   0x5   :  { %14 = vsyncpa [#allocation3 + $0x1], 0 }
   0x6   :  { %15 = vsyncpa [#allocation8], 0 }
   0x7   :  { %17 = vsyncpa [#allocation8 + $0x1], 0 }
   0x8   :  { %18 = vsyncpa [#allocation4], 0 }
   0x9   :  { %20 = vsyncpa [#allocation4 + $0x1], 0 }
   0xa   :  { %21 = vsyncpa [#allocation12], 0 }
   0xb   :  { %23 = vsyncpa [#allocation12 + $0x1], 0  ;;  %s1430_s18 = smov 0   ;;  %s1432_s19 = smov 0  }
   0xc   :  { %s1434_s20 = smov 0   ;;  %s1436_s21 = smov 0  }
   0xd   :  { %s1438_s22 = smov 0   ;;  %s1440_s23 = smov 0  }
   0xe LB: > { %1825 = sst [smem:[#allocation18_spill]] %s1376_s20  ;;  %s41_s24 = sadd.s32 1, %s1384_s22  ;;  %s1388_s23 = sphi %s1440_s23, %s29_s23   ;;  %s1384_s22 = sphi %s1438_s22, %s1857_s22   ;;  %s1380_s21 = sphi %s1436_s21, %s1856_s21   ;;  %s1376_s20 = sphi %s1434_s20, %s1852_s20   ;;  %s1372_s19 = sphi %s1432_s19, %s1855_s19   ;;  %s1368_s18 = sphi %s1430_s18, %s1854_s18  }
   0xf   : > { %1826 = sst [smem:[#allocation19_spill]] %s1388_s23  ;;  %s71_s25 = sadd.s32 1, %s1376_s20 }
  0x10   : > { %p43_p0 = scmp.ge.s32.totalorder %s41_s24, 2  ;;  %p1809_p1 = scmp.ne.s32.totalorder %s1376_s20, %s1372_s19 }
  0x11   : > { %p79_p2 = scmp.eq.s32.totalorder %s1388_s23, 0  ;;  %p1090_p5 = scmp.lt.s32.totalorder %s1388_s23, 2 }
  0x12   : > { %s1859_s24 = smov (%p43_p0, %s41_s24), 0  ;;  %s1475_s27 = sand.u32 1, %s1376_s20  }
  0x13   : > { %1827 = sst [smem:[#allocation20_spill]] %s1859_s24  ;;  %p80_p4 = por %p79_p2, %p1809_p1 }
  0x14   : > { %s66_s26 = ssub.s32 %s1384_s22, %s1859_s24  ;;  %s969_s28 = sshll.u32 %s1475_s27, 5 }
  0x15   : > { %p69_p6 = scmp.eq.s32.totalorder %s66_s26, 0  ;;  %s1004_s29 = sshll.u32 %s1384_s22, 9 }
  0x16   : > { %p1479_p7 = pnand %p1090_p5, %p80_p4  ;;  %s247_s7 = sand.u32 1, %s1388_s23  }
  0x17   : > { %s1484_s6 = scalar_select %p69_p6, %s1376_s20, %s71_s25  }
  0x18   : > { %s1830_s2 = sld [smem:[#allocation23_spill]]  ;;  %s251_s11 = scalar_lea.vmem [#allocation7], %s969_s28 }
  0x19   : > { %1829 = sst [smem:[#allocation21_spill]] %s1484_s6  ;;  %s258_s12 = sshll.u32 %s251_s11, 4  ;;  %s1496_s12 = int_to_ptr.vmem [resolvable:$true] %s258_s12 }
  0x1a   : > { %s1498_s13 = scalar_lea.sflag [#allocation8], %s247_s7  ;;  %p1504_p9 = pneg %p1479_p7 }
  0x1e   : > { %s1492_s10 = scalar_lea.hbm %s1830_s2, %s1004_s29  ;;  %s1168_s25 = scalar_lea.hbm %s1830_s2, 1024 }
  0x1f   : > { %s1163_s14 = scalar_lea.hbm %s1492_s10, 512  ;;  %p1169_p12 = scmp.lt.u32.totalorder %s1492_s10, %s1830_s2 }
  0x20   : > { %p1164_p8 = scmp.ne.s32.totalorder %s1492_s10, %s1163_s14  ;;  %p1170_p13 = scmp.lt.u32.totalorder %s1168_s25, %s1163_s14 }
  0x21   : > { %p1172_p2 = scmp.lt.u32.totalorder %s1163_s14, %s1492_s10 }
  0x22   : > { %p1166_p10 = pnand %p1504_p9, %p1164_p8  ;;  %p1171_p0 = por %p1170_p13, %p1169_p12 }
  0x24   : > { %p1167_p11 = pneg %p1166_p10  ;;  %p1173_p4 = por %p1172_p2, %p1171_p0 }
  0x26   : > { %p1174_p5 = pnand %p1173_p4, %p1167_p11 }
  0x28   : > { %1177 = shalt.err (!%p1174_p5)
}
  0x29   : > { %s1178_s7 = scalar_lea.vmem %s1496_s12, 512  ;;  %s1390_s9 = smov [#allocation7]  }
  0x2a   : > { %p1179_p6 = scmp.ne.s32.totalorder %s1496_s12, %s1178_s7  ;;  %s1183_s11 = sshll.u32 %s1390_s9, 4  ;;  %s1184_s11 = int_to_ptr.vmem [resolvable:$false] %s1183_s11 }
  0x2b   : > { %s1185_s16 = scalar_lea.vmem %s1184_s11, 1024  ;;  %p1186_p3 = scmp.lt.s32.totalorder %s1496_s12, %s1184_s11 }
  0x2c   : > { %p1181_p8 = pnand %p1179_p6, %p1504_p9  ;;  %p1187_p1 = scmp.lt.s32.totalorder %s1185_s16, %s1178_s7 }
  0x2e   : > { %p1182_p10 = pneg %p1181_p8  ;;  %p1188_p12 = por %p1187_p1, %p1186_p3 }
  0x30   : > { %p1189_p13 = pnand %p1188_p12, %p1182_p10 }
  0x32   : > { %1192 = shalt.err (!%p1189_p13)
}
  0x33   : > { %s1810_s14 = smov 128   ;;  %s1812_s17 = smov 8  }
  0x34   : > { %1078 = dma.hbm_to_vmem [thread:$0]  (!%p1479_p7), %s1492_s10, 512, %s1496_s12, %s1498_s13, %s1810_s14, %s1810_s14, %s1812_s17  }
  0x35   : > { %s1532_s25 = sadd.s32 4294967295, %s1388_s23   ;;  %s965_s26 = sadd.s32 4294967294, %s1388_s23  }
  0x36   : > { %p84_p1 = scmp.ne.s32.totalorder %s1372_s19, %s1368_s18  ;;  %p1815_p3 = scmp.eq.s32.totalorder %s1532_s25, 0 }
  0x37   : > { %p162_p11 = scmp.eq.s32.totalorder %s1532_s25, 1  ;;  %p168_p0 = scmp.eq.s32.totalorder %s965_s26, 1 }
  0x38   : > { %p966_p2 = scmp.ge.s32.totalorder %s1388_s23, 1  ;;  %p1542_p4 = por %p1815_p3, %p84_p1 }
  0x39   : > { %p1833_p5 = scmp.ne.s32.totalorder %s1376_s20, %s1372_s19  ;;  %p1553_p8 = por %p168_p0, %p84_p1 }
  0x3a   : > { %s1832_s8 = scalar_select %p1542_p4, 1, 0 }
  0x3b   : > { %p1549_p6 = por %p162_p11, %p1833_p5  ;;  %p203_p10 = scmp.lt.s32.totalorder %s1388_s23, 3 }
  0x3c   : > { %s1835_s12 = scalar_select %p1553_p8, 1, 0 }
  0x3d   : > { %s1834_s10 = scalar_select %p1549_p6, 1, 0 }
  0x3e   : > { %p1558_p12 = pnand %p966_p2, %p203_p10  ;;  %s1837_s1 = sld [smem:[#allocation22_spill]] }
  0x3f   : > { %s229_s26 = scalar_lea.vmem [#allocation6], %s969_s28  ;;  %s226_s9 = scalar_lea.sflag [#allocation3], %s1475_s27 }
  0x40   : > { %s1836_s7 = scalar_select %p1558_p12, 1, 0 }
  0x41   : > { %p1068_p13 = pneg %p1558_p12  ;;  %s237_s14 = sshll.u32 %s229_s26, 4  ;;  %s1573_s14 = int_to_ptr.vmem [resolvable:$true] %s237_s14 }
  0x43   : > { %p1578_p1 = pnand %p1068_p13, %p1815_p3 }
  0x44   : > { %s1567_s16 = scalar_lea.hbm %s1837_s1, %s1004_s29  ;;  %s1198_s6 = scalar_lea.hbm %s1837_s1, 1024 }
  0x45   : > { %s1838_s2 = scalar_select %p1578_p1, 1, 0 }
  0x46   : > { %s1193_s29 = scalar_lea.hbm %s1567_s16, 512  ;;  %p1199_p5 = scmp.lt.u32.totalorder %s1567_s16, %s1837_s1 }
  0x47   : > { %p1194_p11 = scmp.ne.s32.totalorder %s1567_s16, %s1193_s29  ;;  %p1200_p10 = scmp.lt.u32.totalorder %s1198_s6, %s1193_s29 }
  0x48   : > { %p1202_p13 = scmp.lt.u32.totalorder %s1193_s29, %s1567_s16 }
  0x49   : > { %p1196_p0 = pnand %p1194_p11, %p1504_p9  ;;  %p1201_p8 = por %p1200_p10, %p1199_p5 }
  0x4b   : > { %p1197_p2 = pneg %p1196_p0  ;;  %p1203_p3 = por %p1202_p13, %p1201_p8 }
  0x4d   : > { %p1204_p6 = pnand %p1203_p3, %p1197_p2 }
  0x4f   : > { %1207 = shalt.err (!%p1204_p6)
}
  0x50   : > { %s1208_s17 = scalar_lea.vmem %s1573_s14, 512  ;;  %s1393_s24 = smov [#allocation6]  }
  0x51   : > { %p1209_p11 = scmp.ne.s32.totalorder %s1573_s14, %s1208_s17  ;;  %s1213_s11 = sshll.u32 %s1393_s24, 4  ;;  %s1214_s11 = int_to_ptr.vmem [resolvable:$false] %s1213_s11 }
  0x52   : > { %s1215_s28 = scalar_lea.vmem %s1214_s11, 1024  ;;  %p1216_p12 = scmp.lt.s32.totalorder %s1573_s14, %s1214_s11 }
  0x53   : > { %p1211_p0 = pnand %p1209_p11, %p1504_p9  ;;  %p1217_p1 = scmp.lt.s32.totalorder %s1215_s28, %s1208_s17 }
  0x55   : > { %p1212_p4 = pneg %p1211_p0  ;;  %p1218_p5 = por %p1217_p1, %p1216_p12 }
  0x57   : > { %p1219_p10 = pnand %p1218_p5, %p1212_p4 }
  0x59   : > { %1222 = shalt.err (!%p1219_p10)
}
  0x5a   : > { %s1839_s6 = smov 8   ;;  %s1840_s29 = smov 128  }
  0x5b   : > { %1075 = dma.hbm_to_vmem [thread:$0]  (!%p1479_p7), %s1567_s16, 512, %s1573_s14, %s226_s9, %s1840_s29, %s1840_s29, %s1839_s6  }
  0x5c   : > { %s1006_s26 = sshll.u32 %s1384_s22, 8  ;;  %s1223_s17 = scalar_lea.hbm %s1803_s0, 16 }
  0x5d   : > { %p1224_p3 = scmp.ne.s32.totalorder %s1803_s0, %s1223_s17  ;;  %p1841_p4 = scmp.ne.s32.totalorder %s1838_s2, 0 }
  0x5e   : > { %p1230_p1 = scmp.lt.u32.totalorder %s1223_s17, %s1803_s0 }
  0x5f   : > { %p1225_p6 = pneg %p1841_p4 }
  0x61   : > { %p1226_p8 = pnand %p1225_p6, %p1224_p3 }
  0x63   : > { %p1227_p12 = pneg %p1226_p8 }
  0x65   : > { %p1232_p2 = pnand %p1230_p1, %p1227_p12 }
  0x67   : > { %1235 = shalt.err (!%p1232_p2)
}
  0x68   : > { %s1394_s14 = smov [#allocation2]   ;;  %s1629_s11 = scalar_lea.hbm %s1806_s3, %s1006_s26 }
  0x69   : > { %1071 = dma.hbm_to_smem (!%p1841_p4), %s1803_s0, 16, %s1394_s14, [#allocation5]  }
  0x6a   : > { %s1842_s28 = sshll.u32 %s1475_s27, 4  ;;  %s1236_s2 = scalar_lea.hbm %s1629_s11, 256 }
  0x6b   : > { %s272_s20 = scalar_lea.vmem [#allocation9], %s1842_s28  ;;  %p1237_p13 = scmp.ne.s32.totalorder %s1629_s11, %s1236_s2 }
  0x6c   : > { %s279_s23 = sshll.u32 %s272_s20, 4  ;;  %s1241_s16 = scalar_lea.hbm %s1806_s3, 512  ;;  %s1633_s23 = int_to_ptr.vmem [resolvable:$true] %s279_s23 }
  0x6d   : > { %p1239_p11 = pnand %p1237_p13, %p1504_p9  ;;  %p1242_p5 = scmp.lt.u32.totalorder %s1629_s11, %s1806_s3 }
  0x6e   : > { %p1243_p10 = scmp.lt.u32.totalorder %s1241_s16, %s1236_s2  ;;  %p1245_p4 = scmp.lt.u32.totalorder %s1236_s2, %s1629_s11 }
  0x6f   : > { %p1240_p0 = pneg %p1239_p11 }
  0x70   : > { %p1244_p3 = por %p1243_p10, %p1242_p5 }
  0x72   : > { %p1246_p6 = por %p1245_p4, %p1244_p3 }
  0x74   : > { %p1247_p8 = pnand %p1246_p6, %p1240_p0 }
  0x76   : > { %1250 = shalt.err (!%p1247_p8)
}
  0x77   : > { %s1251_s27 = scalar_lea.vmem %s1633_s23, 256  ;;  %s1395_s9 = smov [#allocation9]  }
  0x78   : > { %p1252_p12 = scmp.ne.s32.totalorder %s1633_s23, %s1251_s27  ;;  %s1256_s24 = sshll.u32 %s1395_s9, 4  ;;  %s1257_s24 = int_to_ptr.vmem [resolvable:$false] %s1256_s24 }
  0x79   : > { %s1258_s28 = scalar_lea.vmem %s1257_s24, 512  ;;  %p1259_p13 = scmp.lt.s32.totalorder %s1633_s23, %s1257_s24 }
  0x7a   : > { %p1254_p1 = pnand %p1252_p12, %p1504_p9  ;;  %p1260_p11 = scmp.lt.s32.totalorder %s1258_s28, %s1251_s27 }
  0x7c   : > { %p1255_p2 = pneg %p1254_p1  ;;  %p1261_p5 = por %p1260_p11, %p1259_p13 }
  0x7e   : > { %p1262_p10 = pnand %p1261_p5, %p1255_p2 }
  0x80   : > { %1265 = shalt.err (!%p1262_p10)
}
  0x81   : > { %1081 = dma.hbm_to_vmem [thread:$0]  (!%p1479_p7), %s1629_s11, 256, %s1633_s23, %s1498_s13, %s1840_s29, %s1840_s29, %s1839_s6  }
  0x82   : > { %p1843_p9 = scmp.ne.s32.totalorder %s1836_s7, 0 }
  0x83   : > { %p1844_p0 = scmp.eq.s32.totalorder (!%p1843_p9), %s1532_s25, 0 }
  0x84   : > { %291 = sbr.rel (%p1843_p9) target bundleno = 1051 (0x41b), region = 36 }
  0x8b   : > { %1347 = dma.done.wait (%p1844_p0), [#allocation5], 16   ;;  %p1845_p3 = pmov %p1844_p0 }
  0x8c   : > { %s1667_s15 = sand.u32 1, %s1372_s19   ;;  %p1846_p4 = scmp.ne.s32.totalorder %s1832_s8, 0 }
  0x8d   : > { %1349 = vsyncadd (%p1845_p3), [#allocation5], 4294967280  ;;  %s980_s30 = sshll.u32 %s1667_s15, 5  ;;  %s298_s20 = scalar_lea.sflag [#allocation3], %s1667_s15 }
  0x8e   : > { %s301_s2 = scalar_lea.vmem [#allocation6], %s980_s30 }
  0x8f   : > { %1351 = dma.done.wait (%p1846_p4), %s298_s20, 512  }
  0x90   : > { %1353 = vsyncadd (%p1846_p4), %s298_s20, 4294966784  ;;  %s306_s13 = sand.u32 1, %s1532_s25   ;;  %s310_s6 = scalar_lea.vmem [#allocation7], %s980_s30 }
  0x91   : > { %s307_s7 = scalar_lea.sflag [#allocation8], %s306_s13 }
  0x92   : > { %1355 = dma.done.wait (%p1846_p4), %s307_s7, 768  }
  0x93   : > { %1357 = vsyncadd (%p1846_p4), %s307_s7, 4294966528  ;;  %s1681_s29 = sshll.u32 %s1667_s15, 4 }
  0x94   : > { %s319_s11 = scalar_lea.vmem [#allocation9], %s1681_s29 }
  0x95   : > { %324 = sfence }
  0x96   : > { %v364_v0 = vld [vmem:[%s301_s2] sm:$0xff]  ;;  %v988_v1 = vld [vmem:[%s301_s2 + $0x10] sm:$0xff]  ;;  %v365_v2 = vld [vmem:[%s301_s2 + $0x8] sm:$0xff]  ;;  %vm402_vm0 = vcmask 130048   ;;  %s987_s25 = sshll.u32 %s1380_s21, 1  ;;  %s361_s14 = scalar_lea.vmem [#allocation11], %s1681_s29 }
  0x97   : > { %v366_v3 = vmul.f32 0.17677669, %v364_v0  ;;  %v514_v4 = vmul.f32 0.17677669, %v988_v1  ;;  %v367_v5 = vmul.f32 0.17677669, %v365_v2 }
  0x98   : > { %v989_v6 = vld [vmem:[%s301_s2 + $0x18] sm:$0xff]  ;;  %v368_v7 = vld [vmem:[%s310_s6] sm:$0xff]  ;;  %v369_v8 = vld [vmem:[%s310_s6 + $0x8] sm:$0xff]  ;;  %s650_s8 = sadd.s32 1, %s987_s25  ;;  %s503_s23 = sld [smem:[#allocation2 + %s987_s25]] }
  0x99   : > { %370 = vxpose.xlu0.b32.start [1/2] (short) (narrow) %v366_v3, 16  ;;  %519 = vxpose.xlu1.b32.start [1/2] (short) (narrow) %v514_v4, 16  ;;  %v515_v9 = vmul.f32 0.17677669, %v989_v6  ;;  %v1042_v10 = vpack.c.bf16 %v369_v8, %v368_v7  ;;  %v990_v11 = vld [vmem:[%s310_s6 + $0x10] sm:$0xff]  ;;  %v991_v12 = vld [vmem:[%s310_s6 + $0x18] sm:$0xff] }
  0x9a   : > { %v1046_v13 = vpack.c.bf16 %v991_v12, %v990_v11  ;;  %v663_v46 = vld [vmem:[%s319_s11] sm:$0xff]  ;;  %v664_v47 = vld [vmem:[%s319_s11 + $0x8] sm:$0xff]  ;;  %s651_s17 = sld [smem:[#allocation2 + %s650_s8]]  ;;  %s1007_s16 = sshll.u32 %s1380_s21, 8 }
  0x9b   : > { %1043 = vmatprep.subr.bf16.mxu0 %v1042_v10  ;;  %v1050_v48 = vpack.c.bf16 %v664_v47, %v663_v46  ;;  %s1712_s27 = scalar_lea.hbm %s1808_s5, %s1007_s16  ;;  %s788_s9 = sshll.u32 %s361_s14, 4  ;;  %s1714_s9 = int_to_ptr.vmem [resolvable:$true] %s788_s9 }
  0x9c   : > { %1045 = vmatpush3.bf16.msra.mxu0 %v1042_v10  ;;  %1047 = vmatprep.subr.bf16.mxu1 %v1046_v13  ;;  %s755_s24 = scalar_lea.sflag [#allocation12], %s1667_s15  ;;  %s1266_s28 = scalar_lea.vmem %s1714_s9, 256 }
  0x9d   : > { %371 = vxpose.xlu0.b32.end [2/2] (short) (narrow) %v367_v5, 16  ;;  %520 = vxpose.xlu1.b32.end [2/2] (short) (narrow) %v515_v9, 16  ;;  %p1267_p7 = scmp.ne.s32.totalorder %s1714_s9, %s1266_s28  ;;  %p1847_p6 = scmp.ne.s32.totalorder %s1834_s10, 0 }
  0x9e   : > { %1049 = vmatpush3.bf16.msra.mxu1 %v1046_v13  ;;  %1051 = vmatprep.subr.bf16.mxu0 %v1050_v48  ;;  %v504_v53 = vstv %s503_s23  ;;  %s1396_s30 = smov [#allocation11]  }
  0x9f   : > { %p1268_p8 = pnand %p1267_p7, %p1847_p6  ;;  %s1270_s20 = sshll.u32 %s1396_s30, 4  ;;  %s1271_s20 = int_to_ptr.vmem [resolvable:$false] %s1270_s20 }
  0xa0   : > { %v652_v55 = vstv %s651_s17  ;;  %s1272_s2 = scalar_lea.vmem %s1271_s20, 512  ;;  %p1273_p1 = scmp.lt.s32.totalorder %s1714_s9, %s1271_s20 }
  0xa1   : > { %p1269_p12 = pneg %p1268_p8  ;;  %p1274_p2 = scmp.lt.s32.totalorder %s1272_s2, %s1266_s28 }
  0xa3   : > { %p1275_p13 = por %p1274_p2, %p1273_p1 }
  0xa5   : > { %p1276_p11 = pnand %p1275_p13, %p1269_p12 }
 0x119   : > { %v386_v14 = vpop.trf.xlu0  ;;  %v535_v15 = vpop.trf.xlu1 }
 0x11a   : > { %1025 = vmatprep.mubr.msk.f32.mxu0 %vm402_vm0, %v386_v14  ;;  %1032 = vmatprep.mubr.msk.f32.mxu1 %vm402_vm0, %v535_v15 }
 0x11d   : > { %v387_v16 = vpop.trf.xlu0  ;;  %v536_v17 = vpop.trf.xlu1 }
 0x11e   : > { %1026 = vmatmul.mubr.msk.f32.vlgmr.msra.gmra.mrb[0].mxu0 %vm402_vm0, %v387_v16  ;;  %1033 = vmatmul.mubr.msk.f32.vlgmr.msra.gmra.mrb[0].mxu1 %vm402_vm0, %v536_v17 }
 0x11f   : > { %1053 = vmatpush3.bf16.msra.mxu0 %v1050_v48 }
 0x1f1   : > { %v1027_v18 = vpop.f32.mrb[0].mxu0  ;;  %v1034_v19 = vpop.f32.mrb[0].mxu1 }
 0x1f2   : > { %v475_v20 = vpop.f32.mrb[1].mxu0  ;;  %v487_v21 = vsel %vm402_vm0, %v1027_v18, -inf  ;;  %v623_v22 = vpop.f32.mrb[1].mxu1  ;;  %v635_v25 = vsel %vm402_vm0, %v1034_v19, -inf }
 0x1f3   : > { %488 = vmax.xlane.f32.xlu1 %v487_v21  ;;  %v484_v23 = vsel %vm402_vm0, %v475_v20, -inf  ;;  %v632_v24 = vsel %vm402_vm0, %v623_v22, -inf }
 0x1f4   : > { %485 = vmax.xlane.f32.xlu0 %v484_v23 }
 0x1f7   : > { %633 = vmax.xlane.f32.xlu1 %v632_v24 }
 0x1fb   : > { %636 = vmax.xlane.f32.xlu1 %v635_v25 }
 0x280   : > { %v489_v26 = vpop.xlane.xlu1 %488 }
 0x281   : > { %v491_v27 = vsub.f32 %v1027_v18, %v489_v26  ;;  %v486_v28 = vpop.xlane.xlu0 %485 }
 0x282   : > { %v490_v29 = vsub.f32 %v475_v20, %v486_v28 }
 0x283   : > { %v494_v30 = vmul.f32 1.442695, %v491_v27 }
 0x284   : > { %v492_v31 = vmul.f32 1.442695, %v490_v29  ;;  %v634_v32 = vpop.xlane.xlu1 %633 }
 0x285   : > { %v638_v33 = vsub.f32 %v623_v22, %v634_v32 }
 0x286   : > { %1147 = vpow2.f32 %v492_v31 }
 0x287   : > { %v640_v34 = vmul.f32 1.442695, %v638_v33  ;;  %1149 = vpow2.f32 %v494_v30 }
 0x288   : > { %v637_v35 = vpop.xlane.xlu1 %636 }
 0x289   : > { %1151 = vpow2.f32 %v640_v34  ;;  %v639_v36 = vsub.f32 %v1034_v19, %v637_v35 }
 0x28b   : > { %v642_v37 = vmul.f32 1.442695, %v639_v36 }
 0x28d   : > { %1153 = vpow2.f32 %v642_v37 }
 0x290   : > { %v1148_v38 = vpop.eup %1147 }
 0x291   : > { %v496_v39 = vsel %vm402_vm0, %v1148_v38, 0.0  ;;  %v1150_v40 = vpop.eup %1149 }
 0x292   : > { %497 = vadd.xlane.f32.xlu0 %v496_v39  ;;  %v499_v43 = vsel %vm402_vm0, %v1150_v40, 0.0 }
 0x293   : > { %v1152_v41 = vpop.eup %1151 }
 0x294   : > { %v644_v42 = vsel %vm402_vm0, %v1152_v41, 0.0 }
 0x295   : > { %645 = vadd.xlane.f32.xlu1 %v644_v42 }
 0x296   : > { %500 = vadd.xlane.f32.xlu0 %v499_v43 }
 0x297   : > { %v1154_v44 = vpop.eup %1153 }
 0x298   : > { %v647_v45 = vsel %vm402_vm0, %v1154_v44, 0.0 }
 0x299   : > { %648 = vadd.xlane.f32.xlu1 %v647_v45 }
 0x31f   : > { %v498_v49 = vpop.xlane.xlu0 %497 }
 0x320   : > { %1155 = vrcp.f32 %v498_v49 }
 0x322   : > { %v646_v50 = vpop.xlane.xlu1 %645 }
 0x323   : > { %1157 = vrcp.f32 %v646_v50  ;;  %v501_v51 = vpop.xlane.xlu0 %500 }
 0x324   : > { %1159 = vrcp.f32 %v501_v51 }
 0x326   : > { %v649_v52 = vpop.xlane.xlu1 %648 }
 0x327   : > { %1161 = vrcp.f32 %v649_v52 }
 0x32a   : > { %v1156_v54 = vpop.eup %1155 }
 0x32b   : > { %v506_v56 = vmul.f32 %v1156_v54, %v504_v53 }
 0x32d   : > { %v1158_v57 = vpop.eup %1157  ;;  %v509_v61 = vmul.f32 %v1148_v38, %v506_v56 }
 0x32e   : > { %v1160_v58 = vpop.eup %1159  ;;  %v654_v59 = vmul.f32 %v1158_v57, %v652_v55 }
 0x32f   : > { %v508_v60 = vmul.f32 %v1160_v58, %v504_v53 }
 0x330   : > { %v657_v62 = vmul.f32 %v1152_v41, %v654_v59 }
 0x331   : > { %v1162_v63 = vpop.eup %1161  ;;  %v510_v2 = vmul.f32 %v1150_v40, %v508_v60 }
 0x332   : > { %v656_v0 = vmul.f32 %v1162_v63, %v652_v55  ;;  %v659_v1 = vadd.f32 %v657_v62, %v509_v61 }
 0x334   : > { %v658_v3 = vmul.f32 %v1154_v44, %v656_v0  ;;  %1039 = vmatprep.mubr.msk.f32.mxu0 %vm402_vm0, %v659_v1  ;;  %661 = vst.msk [vmem:[%s361_s14] sm:$0xff] %vm402_vm0, %v659_v1 }
 0x336   : > { %v660_v4 = vadd.f32 %v658_v3, %v510_v2 }
 0x338   : > { %1040 = vmatmul.mubr.msk.f32.vlgmr.msra.gmra.mrb[2].mxu0 %vm402_vm0, %v660_v4  ;;  %662 = vst.msk [vmem:[%s361_s14 + $0x8] sm:$0xff] %vm402_vm0, %v660_v4 }
 0x339   : > { %1279 = shalt.err (!%p1276_p11)
}
 0x33a   : > { %s1280_s13 = scalar_lea.hbm %s1712_s27, 256  ;;  %s1284_s11 = scalar_lea.hbm %s1808_s5, 512 }
 0x33b   : > { %p1281_p5 = scmp.ne.s32.totalorder %s1712_s27, %s1280_s13  ;;  %p1285_p0 = scmp.lt.u32.totalorder %s1712_s27, %s1808_s5 }
 0x33c   : > { %p1286_p3 = scmp.lt.u32.totalorder %s1284_s11, %s1280_s13  ;;  %p1288_p7 = scmp.lt.u32.totalorder %s1280_s13, %s1712_s27 }
 0x33d   : > { %p1282_p10 = pnand %p1281_p5, %p1847_p6 }
 0x33e   : > { %p1287_p4 = por %p1286_p3, %p1285_p0 }
 0x33f   : > { %p1283_p9 = pneg %p1282_p10 }
 0x340   : > { %p1289_p8 = por %p1288_p7, %p1287_p4 }
 0x342   : > { %p1290_p12 = pnand %p1289_p8, %p1283_p9 }
 0x344   : > { %1293 = shalt.err (!%p1290_p12)
}
 0x345   : > { %s1397_s23 = smov 128   ;;  %s1398_s17 = smov 8   ;;  %vm746_vm1 = vcmask 261120  }
 0x346   : > { %1065 = dma.vmem_to_hbm [thread:$0]  (%p1847_p6), %s1714_s9, 256, %s1712_s27, %s755_s24, %s1397_s23, %s1397_s23, %s1398_s17  }
 0x347   : > { %s354_s14 = scalar_lea.vmem [#allocation10], %s1681_s29  ;;  %s1751_s30 = scalar_lea.hbm %s1807_s4, %s1007_s16 }
 0x348   : > { %s770_s26 = sshll.u32 %s354_s14, 4  ;;  %s750_s20 = scalar_lea.sflag [#allocation4], %s1667_s15  ;;  %s1744_s26 = int_to_ptr.vmem [resolvable:$true] %s770_s26 }
 0x349   : > { %s1294_s27 = scalar_lea.vmem %s1744_s26, 256  ;;  %s1399_s29 = smov [#allocation10]  }
 0x34a   : > { %p1295_p1 = scmp.ne.s32.totalorder %s1744_s26, %s1294_s27  ;;  %s1298_s9 = sshll.u32 %s1399_s29, 4  ;;  %s1299_s9 = int_to_ptr.vmem [resolvable:$false] %s1298_s9 }
 0x34b   : > { %s1300_s24 = scalar_lea.vmem %s1299_s9, 512  ;;  %p1301_p11 = scmp.lt.s32.totalorder %s1744_s26, %s1299_s9 }
 0x34c   : > { %p1296_p2 = pnand %p1295_p1, %p1847_p6  ;;  %p1302_p5 = scmp.lt.s32.totalorder %s1300_s24, %s1294_s27 }
 0x34e   : > { %p1297_p13 = pneg %p1296_p2  ;;  %p1303_p10 = por %p1302_p5, %p1301_p11 }
 0x350   : > { %p1304_p9 = pnand %p1303_p10, %p1297_p13 }
 0x40b   : > { %v1041_v5 = vpop.f32.mrb[2].mxu0 }
 0x40c   : > { %748 = vst.msk [vmem:[%s354_s14 + $0x8] sm:$0xff] %vm746_vm1, %v1041_v5  ;;  %v737_v6 = vpop.f32.mrb[3].mxu0 }
 0x40d   : > { %747 = vst.msk [vmem:[%s354_s14] sm:$0xff] %vm746_vm1, %v737_v6 }
 0x40e   : > { %1307 = shalt.err (!%p1304_p9)
}
 0x40f   : > { %s1308_s21 = scalar_lea.hbm %s1751_s30, 256  ;;  %s1312_s13 = scalar_lea.hbm %s1807_s4, 512 }
 0x410   : > { %p1309_p0 = scmp.ne.s32.totalorder %s1751_s30, %s1308_s21  ;;  %p1313_p7 = scmp.lt.u32.totalorder %s1751_s30, %s1807_s4 }
 0x411   : > { %p1314_p8 = scmp.lt.u32.totalorder %s1312_s13, %s1308_s21  ;;  %p1316_p1 = scmp.lt.u32.totalorder %s1308_s21, %s1751_s30 }
 0x412   : > { %p1310_p3 = pnand %p1309_p0, %p1847_p6 }
 0x413   : > { %p1315_p12 = por %p1314_p8, %p1313_p7 }
 0x414   : > { %p1311_p4 = pneg %p1310_p3 }
 0x415   : > { %p1317_p2 = por %p1316_p1, %p1315_p12 }
 0x417   : > { %p1318_p13 = pnand %p1317_p2, %p1311_p4 }
 0x419   : > { %1321 = shalt.err (!%p1318_p13)
}
 0x41a   : > { %1064 = dma.vmem_to_hbm [thread:$0]  (%p1847_p6), %s1744_s26, 256, %s1751_s30, %s750_s20, %s1397_s23, %s1397_s23, %s1398_s17  }
 0x41b PF: > { %s1848_s11 = sld [smem:[#allocation19_spill]]  ;;  %s803_s25 = sand.u32 1, %s1368_s18  }
 0x41c   : > { %p1849_p11 = scmp.ne.s32.totalorder %s1835_s12, 0  ;;  %s804_s8 = scalar_lea.sflag [#allocation4], %s803_s25 }
 0x421   : > { %p1850_p5 = scmp.ge.s32.totalorder %s1848_s11, 2 }
 0x423   : > { %p1083_p10 = pnand %p1850_p5, %p1849_p11 }
 0x425   : > { %1359 = dma.done.wait (!%p1083_p10), %s804_s8, 256  }
 0x426   : > { %1361 = vsyncadd (!%p1083_p10), %s804_s8, 4294967040  ;;  %s813_s10 = scalar_lea.sflag [#allocation12], %s803_s25 }
 0x427   : > { %1363 = dma.done.wait (!%p1083_p10), %s813_s10, 256  }
 0x428   : > { %1365 = vsyncadd (!%p1083_p10), %s813_s10, 4294967040  ;;  %s29_s23 = sadd.s32 1, %s1848_s11   ;;  %s1851_s15 = sld [smem:[#allocation18_spill]] }
 0x429   : > { %p26_p9 = scmp.ge.s32.totalorder %s29_s23, 4   ;;  %s1852_s20 = sld [smem:[#allocation21_spill]] }
 0x42a   : > { %s1853_s17 = sld [smem:[#allocation20_spill]]  ;;  %s1854_s18 = smov %s1372_s19 }
 0x42b   : > { %s1856_s21 = smov %s1384_s22  ;;  %28 = sbr.rel (!%p26_p9) target bundleno = 14 (0xe), region = 129 }
 0x42e   : > { %s1855_s19 = smov %s1851_s15 }
 0x430   : > { %s1857_s22 = smov %s1853_s17 }
 0x432   :  { %818 = vsyncpa [#allocation3], 1 }
 0x433   :  { %820 = vsyncpa [#allocation3 + $0x1], 1 }
 0x434   :  { %821 = vsyncpa [#allocation8], 1 }
 0x435   :  { %823 = vsyncpa [#allocation8 + $0x1], 1 }
 0x436   :  { %824 = vsyncpa [#allocation4], 1 }
 0x437   :  { %826 = vsyncpa [#allocation4 + $0x1], 1 }
 0x438   :  { %827 = vsyncpa [#allocation12], 1 }
 0x439   :  { %829 = vsyncpa [#allocation12 + $0x1], 1 }
 0x43a   :  { %830 = vsyncpa [#allocation5], 1 }
 0x43b   :  { %832 = vsyncpa [#allocation5 + $0x1], 1 }

</bundles_post_ra>
